<compile_context>
chip_gen: v5e
topology: v5e:2x2
jax: 0.10.0
libtpu: 0.0.40
codegen_flags: <defaults>
</compile_context>

<pallas_src>
import functools

import jax
import jax.numpy as jnp
from jax.experimental import pallas as pl
from jax.experimental.pallas import tpu as pltpu


def _cdiv(a: int, b: int) -> int:
    return -(-a // b)


def _round_up(x: int, m: int) -> int:
    return _cdiv(x, m) * m


def _linear_zeros_kernel(x_ref, w_ref, b_ref, scale_ref, o_ref):
    # x_ref:     (TILE_N, C_in)    streamed per row tile
    # w_ref:     (C_in, TILE_C)    resident (pre-transposed in the wrapper)
    # b_ref:     (1, TILE_C) f32   resident
    # scale_ref: (1, TILE_C) f32   resident; = exp(logs * logscale_factor)
    # o_ref:     (TILE_N, TILE_C)
    acc = jnp.dot(x_ref[...], w_ref[...], preferred_element_type=jnp.float32)
    o_ref[...] = ((acc + b_ref[...]) * scale_ref[...]).astype(o_ref.dtype)


@functools.partial(
    jax.jit, static_argnames=("logscale_factor", "single_buffer_resident")
)
def _linear_zeros_impl(x, weight, bias, logs, logscale_factor,
                       single_buffer_resident):
    *lead, c_in = x.shape
    c_out = weight.shape[0]
    x2 = x.reshape(-1, c_in)
    n = x2.shape[0]

    x_item = jnp.dtype(x.dtype).itemsize
    w_item = jnp.dtype(weight.dtype).itemsize
    out_item = x_item
    # Sub-32-bit dtypes pack rows along sublanes: keep tiles on packed-row
    # multiples so streamed x/out tiles get unmasked, full-sublane layouts.
    row_mult = {4: 8, 2: 16, 1: 32}.get(x_item, 8)

    # ---- generation-aware VMEM budget (~20% headroom under physical) ----
    try:
        vmem_cap = int(pltpu.get_tpu_info().vmem_capacity_bytes)
    except Exception:
        vmem_cap = 64 << 20  # conservative (v7x-sized) fallback
    vmem_budget = int(vmem_cap * 0.8)
    target_rows = 1024 if vmem_cap >= (96 << 20) else 512  # v5e/v6e vs v7x

    rb = 1 if single_buffer_resident else 2  # resident buffer multiplier

    # ---- column (C_out) tiling ----
    if c_out < 128:
        # Unpadded: block last dim == full array dim (masked stores) beats
        # doubling output writeback + an extra un-pad slice for tiny C_out.
        c_out_p = c_out
        tile_c = c_out
    else:
        c_out_p = _round_up(c_out, 128)  # lane-dense stores, full MXU columns
        w_bytes = c_in * c_out_p * w_item
        if rb * w_bytes <= vmem_budget // 3:
            tile_c = c_out_p  # weight fully resident
        else:
            # Weight too big to sit resident (v7x 64 MiB): tile along C_out.
            tile_c = max(
                128,
                ((vmem_budget // (3 * rb)) // (c_in * w_item)) // 128 * 128,
            )
            c_out_p = _round_up(c_out_p, tile_c)
    num_col_tiles = c_out_p // tile_c

    # ---- row (flattened batch) tiling ----
    n_rounded = _round_up(n, row_mult)
    resident_bytes = rb * (c_in * tile_c * w_item + 2 * tile_c * 4)
    bytes_per_row = 2 * (c_in * x_item + tile_c * out_item)  # dbl-buffered x+out
    max_rows = max(
        row_mult,
        ((vmem_budget - resident_bytes) // max(bytes_per_row, 1))
        // row_mult * row_mult,
    )
    target = max(row_mult, min(target_rows, max_rows))
    num_row_tiles = _cdiv(n_rounded, target)
    if num_row_tiles < 2 and n_rounded >= 2 * row_mult:
        num_row_tiles = 2  # >=2 grid steps so both v7x TensorCores get work
    tile_n = _round_up(_cdiv(n_rounded, num_row_tiles), row_mult)
    n_p = tile_n * num_row_tiles  # padding bounded by < one sublane group/tile

    # ---- one-time parameter prep (cheap XLA glue, outside the hot loop) ----
    if n_p != n:
        x2 = jnp.pad(x2, ((0, n_p - n), (0, 0)))
    if c_out_p != c_out:
        weight = jnp.pad(weight, ((0, c_out_p - c_out), (0, 0)))
        bias = jnp.pad(bias, (0, c_out_p - c_out))
        logs = jnp.pad(logs, (0, c_out_p - c_out))
    w_t = weight.T  # [C_in, C_out_p]: standard (M,K)x(K,N) MXU path, no in-kernel transpose
    bias2d = bias.astype(jnp.float32).reshape(1, c_out_p)
    scale2d = jnp.exp(
        logs.astype(jnp.float32) * logscale_factor
    ).reshape(1, c_out_p)

    resident_kwargs = (
        dict(pipeline_mode=pl.Buffered(1)) if single_buffer_resident else {}
    )

    # Grid: C_out tiles outer (weight fetched once per column tile), row tiles
    # inner (x / out streamed & double-buffered every step).
    grid = (num_col_tiles, num_row_tiles)

    cost = pl.CostEstimate(
        flops=2 * n_p * c_in * c_out_p,
        transcendentals=0,
        bytes_accessed=(
            num_col_tiles * n_p * c_in * x_item      # x (re-read per col tile)
            + c_in * c_out_p * w_item                # weight read once
            + n_p * c_out_p * out_item               # output writeback
            + 2 * c_out_p * 4                        # bias + scale
        ),
    )

    out = pl.pallas_call(
        _linear_zeros_kernel,
        out_shape=jax.ShapeDtypeStruct((n_p, c_out_p), x.dtype),
        grid_spec=pltpu.PrefetchScalarGridSpec(
            num_scalar_prefetch=0,
            grid=grid,
            in_specs=[
                pl.BlockSpec((tile_n, c_in), lambda j, i: (i, 0)),    # streamed x
                pl.BlockSpec((c_in, tile_c), lambda j, i: (0, j),     # resident W^T
                             **resident_kwargs),
                pl.BlockSpec((1, tile_c), lambda j, i: (0, j),        # resident bias
                             **resident_kwargs),
                pl.BlockSpec((1, tile_c), lambda j, i: (0, j),        # resident scale
                             **resident_kwargs),
            ],
            out_specs=pl.BlockSpec((tile_n, tile_c), lambda j, i: (i, j)),
        ),
        compiler_params=pltpu.CompilerParams(
            dimension_semantics=("parallel", "parallel"),
            vmem_limit_bytes=vmem_budget,
        ),
        cost_estimate=cost,
    )(x2, w_t, bias2d, scale2d)

    if n_p != n or c_out_p != c_out:
        out = out[:n, :c_out]
    return out.reshape(*lead, c_out)


def linear_zeros_forward(x, weight, bias, logs, logscale_factor=3):
    """x: [..., C_in]; weight: [C_out, C_in]; bias, logs: [C_out]."""
    try:
        return _linear_zeros_impl(x, weight, bias, logs, logscale_factor, True)
    except Exception:
        # pl.Buffered(1) (single-buffered resident operands) not available on
        # this JAX version -- fall back to default double buffering.
        return _linear_zeros_impl(x, weight, bias, logs, logscale_factor, False)


def linear_zeros_ref(x, weight, bias, logs, logscale_factor=3):
    return (x @ weight.T + bias) * jnp.exp(logs * logscale_factor)


if __name__ == "__main__":
    key = jax.random.PRNGKey(0)
    B, S, C_IN, C_OUT = 2, 8, 32, 64  # x: [batch, seq, in_channels]
    LOGSCALE = 3

    kx, kw, kb, kl = jax.random.split(key, 4)
    x = jax.random.normal(kx, (B, S, C_IN), dtype=jnp.float32)

    # Faithful __init__: weight, bias, logs all zeros -> output is zeros.
    weight = jnp.zeros((C_OUT, C_IN), dtype=jnp.float32)
    bias = jnp.zeros((C_OUT,), dtype=jnp.float32)
    logs = jnp.zeros((C_OUT,), dtype=jnp.float32)

    out = linear_zeros_forward(x, weight, bias, logs, LOGSCALE)
    jax.block_until_ready(out)
    assert out.shape == (B, S, C_OUT)
    assert jnp.allclose(
        out, linear_zeros_ref(x, weight, bias, logs, LOGSCALE), atol=1e-5
    )

    # Non-trivial params + ragged leading shape (n=15 rows) to exercise the
    # kernel math, row padding / slice-off, and the >=2-grid-step path.
    x_ragged = jax.random.normal(kx, (3, 5, C_IN), dtype=jnp.float32)
    w2 = 0.02 * jax.random.normal(kw, (C_OUT, C_IN), dtype=jnp.float32)
    b2 = 0.1 * jax.random.normal(kb, (C_OUT,), dtype=jnp.float32)
    l2 = 0.05 * jax.random.normal(kl, (C_OUT,), dtype=jnp.float32)
    out2 = linear_zeros_forward(x_ragged, w2, b2, l2, LOGSCALE)
    jax.block_until_ready(out2)
    ref2 = linear_zeros_ref(x_ragged, w2, b2, l2, LOGSCALE)
    assert out2.shape == (3, 5, C_OUT)
    assert jnp.allclose(out2, ref2, atol=1e-4, rtol=1e-4)

    print("KERNEL_OK")
</pallas_src>

<mosaic_0001>
module attributes {stable_mosaic.version = 11 : i64} {
  func.func @_linear_zeros_kernel(%arg0: i32, %arg1: i32, %arg2: memref<8x32xf32, #tpu.memory_space<vmem>>, %arg3: memref<32x64xf32, #tpu.memory_space<vmem>>, %arg4: memref<1x64xf32, #tpu.memory_space<vmem>>, %arg5: memref<1x64xf32, #tpu.memory_space<vmem>>, %arg6: memref<8x64xf32, #tpu.memory_space<vmem>>) attributes {dimension_semantics = [#tpu.dimension_semantics<parallel>, #tpu.dimension_semantics<parallel>], iteration_bounds = array<i64: 1, 2>, scalar_prefetch = 0 : i64, scratch_operands = 0 : i64, tpu.core_type = #tpu.core_type<tc>, window_params = [{transform_indices = @transform_0, window_bounds = array<i64: 8, 32>}, {pipeline_mode = #tpu.pipeline_mode<synchronous>, transform_indices = @transform_1, window_bounds = array<i64: 32, 64>}, {pipeline_mode = #tpu.pipeline_mode<synchronous>, transform_indices = @transform_2, window_bounds = array<i64: 1, 64>}, {pipeline_mode = #tpu.pipeline_mode<synchronous>, transform_indices = @transform_3, window_bounds = array<i64: 1, 64>}, {transform_indices = @transform_4, window_bounds = array<i64: 8, 64>}]} {
    %c0 = arith.constant 0 : index
    %c0_0 = arith.constant 0 : index
    %0 = vector.load %arg2[%c0, %c0_0] : memref<8x32xf32, #tpu.memory_space<vmem>>, vector<8x32xf32>
    %c0_1 = arith.constant 0 : index
    %c0_2 = arith.constant 0 : index
    %1 = vector.load %arg3[%c0_1, %c0_2] : memref<32x64xf32, #tpu.memory_space<vmem>>, vector<32x64xf32>
    %cst = arith.constant dense<0.000000e+00> : vector<8x64xf32>
    %2 = tpu.matmul %0, %1, %cst {dimension_numbers = #tpu.dot_dimension_numbers<[1], [0], [0], [1], [0, 0, 1, 1], [], []>} : vector<8x32xf32>, vector<32x64xf32>, vector<8x64xf32> -> vector<8x64xf32>
    %c0_3 = arith.constant 0 : index
    %c0_4 = arith.constant 0 : index
    %3 = vector.load %arg4[%c0_3, %c0_4] : memref<1x64xf32, #tpu.memory_space<vmem>>, vector<1x64xf32>
    %4 = vector.broadcast %3 : vector<1x64xf32> to vector<8x64xf32>
    %5 = arith.addf %2, %4 : vector<8x64xf32>
    %c0_5 = arith.constant 0 : index
    %c0_6 = arith.constant 0 : index
    %6 = vector.load %arg5[%c0_5, %c0_6] : memref<1x64xf32, #tpu.memory_space<vmem>>, vector<1x64xf32>
    %7 = vector.broadcast %6 : vector<1x64xf32> to vector<8x64xf32>
    %8 = arith.mulf %5, %7 : vector<8x64xf32>
    %c0_7 = arith.constant 0 : index
    %c0_8 = arith.constant 0 : index
    %9 = vector.load %arg6[%c0_7, %c0_8] : memref<8x64xf32, #tpu.memory_space<vmem>>, vector<8x64xf32>
    tpu.vector_store %arg6[%c0_7, %c0_8], %8 {strides = array<i32>} : memref<8x64xf32, #tpu.memory_space<vmem>>, vector<8x64xf32>,
    return
  }
  func.func @transform_0(%arg0: i32, %arg1: i32) -> (i32, i32) {
    %c0_i32 = arith.constant 0 : i32
    %c0_i32_0 = arith.constant 0 : i32
    return %arg1, %c0_i32 : i32, i32
  }
  func.func @transform_1(%arg0: i32, %arg1: i32) -> (i32, i32) {
    %c0_i32 = arith.constant 0 : i32
    %c0_i32_0 = arith.constant 0 : i32
    return %c0_i32, %arg0 : i32, i32
  }
  func.func @transform_2(%arg0: i32, %arg1: i32) -> (i32, i32) {
    %c0_i32 = arith.constant 0 : i32
    %c0_i32_0 = arith.constant 0 : i32
    return %c0_i32, %arg0 : i32, i32
  }
  func.func @transform_3(%arg0: i32, %arg1: i32) -> (i32, i32) {
    %c0_i32 = arith.constant 0 : i32
    %c0_i32_0 = arith.constant 0 : i32
    return %c0_i32, %arg0 : i32, i32
  }
  func.func @transform_4(%arg0: i32, %arg1: i32) -> (i32, i32) {
    %c0_i32 = arith.constant 0 : i32
    return %arg1, %arg0 : i32, i32
  }
}

module attributes {stable_mosaic.version = 11 : i64} {
  func.func @_linear_zeros_kernel(%arg0: i32, %arg1: i32, %arg2: memref<8x32xf32, #tpu.memory_space<vmem>>, %arg3: memref<32x64xf32, #tpu.memory_space<vmem>>, %arg4: memref<1x64xf32, #tpu.memory_space<vmem>>, %arg5: memref<1x64xf32, #tpu.memory_space<vmem>>, %arg6: memref<8x64xf32, #tpu.memory_space<vmem>>) attributes {dimension_semantics = [#tpu.dimension_semantics<parallel>, #tpu.dimension_semantics<parallel>], iteration_bounds = array<i64: 1, 2>, scalar_prefetch = 0 : i64, scratch_operands = 0 : i64, tpu.core_type = #tpu.core_type<tc>, window_params = [{transform_indices = @transform_0, window_bounds = array<i64: 8, 32>}, {transform_indices = @transform_1, window_bounds = array<i64: 32, 64>}, {transform_indices = @transform_2, window_bounds = array<i64: 1, 64>}, {transform_indices = @transform_3, window_bounds = array<i64: 1, 64>}, {transform_indices = @transform_4, window_bounds = array<i64: 8, 64>}]} {
    %c0 = arith.constant 0 : index
    %c0_0 = arith.constant 0 : index
    %0 = vector.load %arg2[%c0, %c0_0] : memref<8x32xf32, #tpu.memory_space<vmem>>, vector<8x32xf32>
    %c0_1 = arith.constant 0 : index
    %c0_2 = arith.constant 0 : index
    %1 = vector.load %arg3[%c0_1, %c0_2] : memref<32x64xf32, #tpu.memory_space<vmem>>, vector<32x64xf32>
    %cst = arith.constant dense<0.000000e+00> : vector<8x64xf32>
    %2 = tpu.matmul %0, %1, %cst {dimension_numbers = #tpu.dot_dimension_numbers<[1], [0], [0], [1], [0, 0, 1, 1], [], []>} : vector<8x32xf32>, vector<32x64xf32>, vector<8x64xf32> -> vector<8x64xf32>
    %c0_3 = arith.constant 0 : index
    %c0_4 = arith.constant 0 : index
    %3 = vector.load %arg4[%c0_3, %c0_4] : memref<1x64xf32, #tpu.memory_space<vmem>>, vector<1x64xf32>
    %4 = vector.broadcast %3 : vector<1x64xf32> to vector<8x64xf32>
    %5 = arith.addf %2, %4 : vector<8x64xf32>
    %c0_5 = arith.constant 0 : index
    %c0_6 = arith.constant 0 : index
    %6 = vector.load %arg5[%c0_5, %c0_6] : memref<1x64xf32, #tpu.memory_space<vmem>>, vector<1x64xf32>
    %7 = vector.broadcast %6 : vector<1x64xf32> to vector<8x64xf32>
    %8 = arith.mulf %5, %7 : vector<8x64xf32>
    %c0_7 = arith.constant 0 : index
    %c0_8 = arith.constant 0 : index
    %9 = vector.load %arg6[%c0_7, %c0_8] : memref<8x64xf32, #tpu.memory_space<vmem>>, vector<8x64xf32>
    tpu.vector_store %arg6[%c0_7, %c0_8], %8 {strides = array<i32>} : memref<8x64xf32, #tpu.memory_space<vmem>>, vector<8x64xf32>,
    return
  }
  func.func @transform_0(%arg0: i32, %arg1: i32) -> (i32, i32) {
    %c0_i32 = arith.constant 0 : i32
    %c0_i32_0 = arith.constant 0 : i32
    return %arg1, %c0_i32 : i32, i32
  }
  func.func @transform_1(%arg0: i32, %arg1: i32) -> (i32, i32) {
    %c0_i32 = arith.constant 0 : i32
    %c0_i32_0 = arith.constant 0 : i32
    return %c0_i32, %arg0 : i32, i32
  }
  func.func @transform_2(%arg0: i32, %arg1: i32) -> (i32, i32) {
    %c0_i32 = arith.constant 0 : i32
    %c0_i32_0 = arith.constant 0 : i32
    return %c0_i32, %arg0 : i32, i32
  }
  func.func @transform_3(%arg0: i32, %arg1: i32) -> (i32, i32) {
    %c0_i32 = arith.constant 0 : i32
    %c0_i32_0 = arith.constant 0 : i32
    return %c0_i32, %arg0 : i32, i32
  }
  func.func @transform_4(%arg0: i32, %arg1: i32) -> (i32, i32) {
    %c0_i32 = arith.constant 0 : i32
    return %arg1, %arg0 : i32, i32
  }
}

</mosaic_0001>

<bundles_post_ra>
// kernel: _linear_zeros_impl.1
= control target key start
LH: loop header
LB: loop body
LE: loop exit
PB: predicated region body
PF: predicated region fallthrough
CT: control target
= control target key end

     0   :  { %9 = vsyncpa [#allocation3], 0  ;;  %s873_s0 = inlined_call_operand.hbm [shape: f32[16,32], index: 0, kind: input, shape index: {}]   ;;  %s874_s1 = inlined_call_operand.hbm [shape: f32[32,64], index: 1, kind: input, shape index: {}]   ;;  %s875_s2 = inlined_call_operand.vmem [shape: f32[1,64], index: 2, kind: input, shape index: {}]   ;;  %s876_s3 = inlined_call_operand.vmem [shape: f32[1,64], index: 3, kind: input, shape index: {}]   ;;  %s877_s4 = inlined_call_operand.hbm [shape: f32[16,64], index: 4, kind: output, shape index: {}]  }
   0x1   :  { %11 = vsyncpa [#allocation3 + $0x1], 0 }
   0x2   :  { %12 = vsyncpa [#allocation6], 0 }
   0x3   :  { %13 = vsyncpa [#allocation4], 0 }
   0x4   :  { %15 = vsyncpa [#allocation4 + $0x1], 0  ;;  %s724_s15 = smov 0   ;;  %s726_s16 = smov 0  }
   0x5   :  { %s728_s17 = smov 0   ;;  %s730_s18 = smov 0  }
   0x6   :  { %s732_s19 = smov 0   ;;  %s734_s20 = smov 0  }
   0x7 LB: > { %s453_s21 = sadd.s32 4294967295, %s694_s20   ;;  %p455_p0 = scmp.ge.s32.totalorder %s694_s20, 1  ;;  %s694_s20 = sphi %s734_s20, %s21_s20   ;;  %s690_s19 = sphi %s732_s19, %s888_s19   ;;  %s686_s18 = sphi %s730_s18, %s887_s18   ;;  %s682_s17 = sphi %s728_s17, %s886_s17   ;;  %s678_s16 = sphi %s726_s16, %s885_s16   ;;  %s674_s15 = sphi %s724_s15, %s884_s15  }
   0x8   : > { %p756_p1 = scmp.eq.s32.totalorder %s453_s21, 0  ;;  %p170_p2 = scmp.lt.s32.totalorder %s694_s20, 3 }
   0x9   : > { %s183_s25 = sshll.u32 %s874_s1, 4  ;;  %s696_s27 = smov [#allocation5]   ;;  %s184_s25 = int_to_ptr.hbm [resolvable:$true] %s183_s25 }
   0xa   : > { %p764_p3 = pnand %p455_p0, %p170_p2  ;;  %s185_s28 = sshll.u32 %s696_s27, 4  ;;  %s186_s28 = int_to_ptr.vmem [resolvable:$true] %s185_s28 }
   0xb   : > { %p459_p6 = scmp.ge.s32.totalorder %s694_s20, 2  ;;  %s697_s29 = smov 128  }
   0xc   : > { %p479_p4 = pneg %p764_p3  ;;  %s698_s30 = smov 8  }
   0xd   : > { %s454_s5 = sadd.s32 4294967294, %s694_s20   ;;  %s30_s6 = sadd.s32 1, %s690_s19 }
   0xe   : > { %p480_p5 = pnand %p479_p4, %p756_p1  ;;  %s40_s7 = sadd.s32 1, %s682_s17 }
   0xf   : > { %p31_p7 = scmp.ge.s32.totalorder %s30_s6, 2  ;;  %p47_p8 = scmp.ne.s32.totalorder %s682_s17, %s678_s16 }
  0x10   : > { %482 = dma.hbm_to_vmem [thread:$0]  (!%p480_p5), %s184_s25, 512, %s186_s28, [#allocation6], %s697_s29, %s697_s29, %s698_s30  }
  0x11   : > { %p48_p9 = scmp.eq.s32.totalorder %s694_s20, 0  ;;  %p53_p10 = scmp.ne.s32.totalorder %s678_s16, %s674_s15 }
  0x12   : > { %s890_s6 = smov (%p31_p7, %s30_s6), 0  ;;  %p157_p13 = scmp.eq.s32.totalorder %s453_s21, 1 }
  0x13   : > { %p783_p11 = por %p48_p9, %p47_p8  ;;  %p789_p12 = por %p756_p1, %p53_p10 }
  0x14   : > { %s37_s10 = ssub.s32 %s690_s19, %s890_s6  ;;  %p163_p2 = scmp.eq.s32.totalorder %s454_s5, 1 }
  0x15   : > { %p38_p0 = scmp.eq.s32.totalorder %s37_s10, 0  ;;  %p795_p4 = por %p157_p13, %p47_p8 }
  0x16   : > { %p492_p5 = scmp.lt.s32.totalorder %s694_s20, 2  ;;  %p803_p7 = por %p163_p2, %p53_p10 }
  0x17   : > { %s801_s12 = scalar_select %p38_p0, %s682_s17, %s40_s7  }
  0x18   : > { %s211_s14 = sand.u32 1, %s682_s17   ;;  %s461_s24 = sshll.u32 %s690_s19, 3 }
  0x19   : > { %s460_s23 = sshll.u32 %s211_s14, 3  ;;  %s219_s21 = scalar_lea.hbm %s873_s0, %s461_s24 }
  0x1a   : > { %s215_s28 = scalar_lea.vmem [#allocation2], %s460_s23  ;;  %s221_s30 = sshll.u32 %s219_s21, 4  ;;  %s222_s30 = int_to_ptr.hbm [resolvable:$true] %s221_s30 }
  0x1b   : > { %s223_s29 = sshll.u32 %s215_s28, 4  ;;  %p484_p8 = pnand %p492_p5, %p783_p11  ;;  %s224_s29 = int_to_ptr.vmem [resolvable:$true] %s223_s29 }
  0x1c   : > { %s212_s5 = scalar_lea.sflag [#allocation3], %s211_s14  ;;  %232 = sbr.rel (%p764_p3) target bundleno = 177 (0xb1), region = 36 }
  0x1d   : > { %486 = dma.hbm_to_vmem [thread:$0]  (!%p484_p8), %s222_s30, 128, %s224_s29, %s212_s5  }
  0x1e   : > { %s817_s7 = sand.u32 (!%p764_p3), 1, %s678_s16  }
  0x1f   : > { %s463_s10 = sshll.u32 (!%p764_p3), %s817_s7, 3  ;;  %s235_s24 = scalar_lea.sflag (!%p764_p3), [#allocation3], %s817_s7 }
  0x20   : > { %s238_s23 = scalar_lea.vmem (!%p764_p3), [#allocation2], %s463_s10 }
  0x21   : > { %661 = dma.done.wait (%p789_p12), %s235_s24, 128  }
  0x22   : > { %663 = vsyncadd (%p789_p12), %s235_s24, 4294967168 }
  0x23   : > { %665 = dma.done.wait (%p756_p1), [#allocation6], 512  }
  0x24   : > { %667 = vsyncadd (%p756_p1), [#allocation6], 4294966784  ;;  %v285_v0 = vld [vmem:[#allocation5 + $0x18] sm:$0xff]  ;;  %v284_v1 = vld [vmem:[#allocation5 + $0x10] sm:$0xff]  ;;  %vm290_vm0 = vcmask 261120   ;;  %s468_s26 = sshll.u32 %s686_s18, 3 }
  0x25   : > { %306 = vmatpush.msra.mxu0 %v285_v0  ;;  %v283_v2 = vld [vmem:[#allocation5 + $0x8] sm:$0xff]  ;;  %v282_v3 = vld [vmem:[#allocation5] sm:$0xff]  ;;  %v281_v4 = vld [vmem:[%s238_s23] sm:$0xff]  ;;  %s333_s25 = scalar_lea.hbm %s877_s4, %s468_s26  ;;  %s274_s28 = scalar_lea.vmem [#allocation7], %s463_s10  ;;  %vm319_vm1 = vcmask 523264  }
  0x26   : > { %v546_v5 = vld [vmem:[%s875_s2] ss:$0 sm:$0xff]  ;;  %s335_s29 = sshll.u32 %s274_s28, 4  ;;  %s337_s30 = sshll.u32 %s333_s25, 4  ;;  %s336_s29 = int_to_ptr.vmem [resolvable:$true] %s335_s29  ;;  %s338_s30 = int_to_ptr.hbm [resolvable:$true] %s337_s30 }
  0x27   : > { %307 = vmatpush.msra.mxu0 %v284_v1  ;;  %v547_v6 = vld [vmem:[%s876_s3] ss:$0 sm:$0xff]  ;;  %s322_s18 = scalar_lea.sflag [#allocation4], %s817_s7  ;;  %s622_s5 = sshra.s32 %s338_s30, 4  ;;  %s623_s5 = int_to_ptr.hbm [resolvable:$true] %s622_s5 }
  0x28   : > { %s624_s24 = scalar_lea.hbm %s623_s5, 8  ;;  %s628_s10 = scalar_lea.hbm %s877_s4, 16 }
  0x29   : > { %308 = vmatpush.msra.mxu0 %v283_v2  ;;  %p625_p1 = scmp.ne.s32.totalorder %s623_s5, %s624_s24  ;;  %p629_p10 = scmp.lt.s32.totalorder %s623_s5, %s877_s4 }
  0x2a   : > { %p630_p11 = scmp.lt.s32.totalorder %s628_s10, %s624_s24 }
  0x2b   : > { %309 = vmatpush.msra.mxu0 %v282_v3  ;;  %p626_p3 = pnand %p625_p1, %p795_p4 }
  0x2c   : > { %466 = vmatmul.msk.f32.vlgmr.msra.gmra.mxu0 %vm290_vm0, %v281_v4  ;;  %p631_p12 = por %p630_p11, %p629_p10 }
  0x2d   : > { %p627_p9 = pneg %p626_p3 }
  0x2f   : > { %p632_p13 = pnand %p631_p12, %p627_p9 }
  0xa9   : > { %v311_v7 = vpop.f32.mrf.mxu0 }
  0xaa   : > { %v312_v8 = vadd.f32 %v546_v5, %v311_v7 }
  0xac   : > { %v318_v9 = vmul.f32 %v547_v6, %v312_v8 }
  0xae   : > { %320 = vst.msk [vmem:[%s274_s28] sm:$0xff] %vm319_vm1, %v318_v9 }
  0xaf   : > { %635 = shalt.err (!%p632_p13)
}
  0xb0   : > { %477 = dma.vmem_to_hbm [thread:$0]  (%p795_p4), %s336_s29, 128, %s338_s30, %s322_s18  }
  0xb1 PF: > { %s349_s7 = sand.u32 1, %s674_s15   ;;  %p488_p0 = pnand %p459_p6, %p803_p7 }
  0xb2   : > { %s350_s22 = scalar_lea.sflag [#allocation4], %s349_s7 }
  0xb3   : > { %p489_p2 = pneg %p488_p0 }
  0xb5   : > { %669 = dma.done.wait (%p489_p2), %s350_s22, 128  }
  0xb6   : > { %671 = vsyncadd (%p489_p2), %s350_s22, 4294967168  ;;  %s21_s20 = sadd.s32 1, %s694_s20   ;;  %s884_s15 = smov %s678_s16 }
  0xb7   : > { %p18_p5 = scmp.ge.s32.totalorder %s21_s20, 4   ;;  %s885_s16 = smov %s682_s17 }
  0xb8   : > { %s886_s17 = smov %s801_s12  ;;  %s887_s18 = smov %s690_s19 }
  0xb9   : > { %s888_s19 = smov %s890_s6  ;;  %20 = sbr.rel (!%p18_p5) target bundleno = 7 (0x7), region = 92 }
  0xbe   :  { %356 = vsyncpa [#allocation3], 1 }
  0xbf   :  { %358 = vsyncpa [#allocation3 + $0x1], 1 }
  0xc0   :  { %359 = vsyncpa [#allocation6], 1 }
  0xc1   :  { %360 = vsyncpa [#allocation4], 1 }
  0xc2   :  { %362 = vsyncpa [#allocation4 + $0x1], 1 }

// kernel: _linear_zeros_impl.1
= control target key start
LH: loop header
LB: loop body
LE: loop exit
PB: predicated region body
PF: predicated region fallthrough
CT: control target
= control target key end

     0   :  { %9 = vsyncpa [#allocation3], 0  ;;  %s873_s0 = inlined_call_operand.hbm [shape: f32[16,32], index: 0, kind: input, shape index: {}]   ;;  %s874_s1 = inlined_call_operand.hbm [shape: f32[32,64], index: 1, kind: input, shape index: {}]   ;;  %s875_s2 = inlined_call_operand.vmem [shape: f32[1,64], index: 2, kind: input, shape index: {}]   ;;  %s876_s3 = inlined_call_operand.vmem [shape: f32[1,64], index: 3, kind: input, shape index: {}]   ;;  %s877_s4 = inlined_call_operand.hbm [shape: f32[16,64], index: 4, kind: output, shape index: {}]  }
   0x1   :  { %11 = vsyncpa [#allocation3 + $0x1], 0 }
   0x2   :  { %12 = vsyncpa [#allocation6], 0 }
   0x3   :  { %13 = vsyncpa [#allocation4], 0 }
   0x4   :  { %15 = vsyncpa [#allocation4 + $0x1], 0  ;;  %s724_s15 = smov 0   ;;  %s726_s16 = smov 0  }
   0x5   :  { %s728_s17 = smov 0   ;;  %s730_s18 = smov 0  }
   0x6   :  { %s732_s19 = smov 0   ;;  %s734_s20 = smov 0  }
   0x7 LB: > { %s453_s21 = sadd.s32 4294967295, %s694_s20   ;;  %p455_p0 = scmp.ge.s32.totalorder %s694_s20, 1  ;;  %s694_s20 = sphi %s734_s20, %s21_s20   ;;  %s690_s19 = sphi %s732_s19, %s888_s19   ;;  %s686_s18 = sphi %s730_s18, %s887_s18   ;;  %s682_s17 = sphi %s728_s17, %s886_s17   ;;  %s678_s16 = sphi %s726_s16, %s885_s16   ;;  %s674_s15 = sphi %s724_s15, %s884_s15  }
   0x8   : > { %p756_p1 = scmp.eq.s32.totalorder %s453_s21, 0  ;;  %p170_p2 = scmp.lt.s32.totalorder %s694_s20, 3 }
   0x9   : > { %s183_s25 = sshll.u32 %s874_s1, 4  ;;  %s696_s27 = smov [#allocation5]   ;;  %s184_s25 = int_to_ptr.hbm [resolvable:$true] %s183_s25 }
   0xa   : > { %p764_p3 = pnand %p455_p0, %p170_p2  ;;  %s185_s28 = sshll.u32 %s696_s27, 4  ;;  %s186_s28 = int_to_ptr.vmem [resolvable:$true] %s185_s28 }
   0xb   : > { %p459_p6 = scmp.ge.s32.totalorder %s694_s20, 2  ;;  %s697_s29 = smov 128  }
   0xc   : > { %p479_p4 = pneg %p764_p3  ;;  %s698_s30 = smov 8  }
   0xd   : > { %s454_s5 = sadd.s32 4294967294, %s694_s20   ;;  %s30_s6 = sadd.s32 1, %s690_s19 }
   0xe   : > { %p480_p5 = pnand %p479_p4, %p756_p1  ;;  %s40_s7 = sadd.s32 1, %s682_s17 }
   0xf   : > { %p31_p7 = scmp.ge.s32.totalorder %s30_s6, 2  ;;  %p47_p8 = scmp.ne.s32.totalorder %s682_s17, %s678_s16 }
  0x10   : > { %482 = dma.hbm_to_vmem [thread:$0]  (!%p480_p5), %s184_s25, 512, %s186_s28, [#allocation6], %s697_s29, %s697_s29, %s698_s30  }
  0x11   : > { %p48_p9 = scmp.eq.s32.totalorder %s694_s20, 0  ;;  %p53_p10 = scmp.ne.s32.totalorder %s678_s16, %s674_s15 }
  0x12   : > { %s890_s6 = smov (%p31_p7, %s30_s6), 0  ;;  %p157_p13 = scmp.eq.s32.totalorder %s453_s21, 1 }
  0x13   : > { %p783_p11 = por %p48_p9, %p47_p8  ;;  %p789_p12 = por %p756_p1, %p53_p10 }
  0x14   : > { %s37_s10 = ssub.s32 %s690_s19, %s890_s6  ;;  %p163_p2 = scmp.eq.s32.totalorder %s454_s5, 1 }
  0x15   : > { %p38_p0 = scmp.eq.s32.totalorder %s37_s10, 0  ;;  %p795_p4 = por %p157_p13, %p47_p8 }
  0x16   : > { %p492_p5 = scmp.lt.s32.totalorder %s694_s20, 2  ;;  %p803_p7 = por %p163_p2, %p53_p10 }
  0x17   : > { %s801_s12 = scalar_select %p38_p0, %s682_s17, %s40_s7  }
  0x18   : > { %s211_s14 = sand.u32 1, %s682_s17   ;;  %s461_s24 = sshll.u32 %s690_s19, 3 }
  0x19   : > { %s460_s23 = sshll.u32 %s211_s14, 3  ;;  %s219_s21 = scalar_lea.hbm %s873_s0, %s461_s24 }
  0x1a   : > { %s215_s28 = scalar_lea.vmem [#allocation2], %s460_s23  ;;  %s221_s30 = sshll.u32 %s219_s21, 4  ;;  %s222_s30 = int_to_ptr.hbm [resolvable:$true] %s221_s30 }
  0x1b   : > { %s223_s29 = sshll.u32 %s215_s28, 4  ;;  %p484_p8 = pnand %p492_p5, %p783_p11  ;;  %s224_s29 = int_to_ptr.vmem [resolvable:$true] %s223_s29 }
  0x1c   : > { %s212_s5 = scalar_lea.sflag [#allocation3], %s211_s14  ;;  %232 = sbr.rel (%p764_p3) target bundleno = 177 (0xb1), region = 36 }
  0x1d   : > { %486 = dma.hbm_to_vmem [thread:$0]  (!%p484_p8), %s222_s30, 128, %s224_s29, %s212_s5  }
  0x1e   : > { %s817_s7 = sand.u32 (!%p764_p3), 1, %s678_s16  }
  0x1f   : > { %s463_s10 = sshll.u32 (!%p764_p3), %s817_s7, 3  ;;  %s235_s24 = scalar_lea.sflag (!%p764_p3), [#allocation3], %s817_s7 }
  0x20   : > { %s238_s23 = scalar_lea.vmem (!%p764_p3), [#allocation2], %s463_s10 }
  0x21   : > { %661 = dma.done.wait (%p789_p12), %s235_s24, 128  }
  0x22   : > { %663 = vsyncadd (%p789_p12), %s235_s24, 4294967168 }
  0x23   : > { %665 = dma.done.wait (%p756_p1), [#allocation6], 512  }
  0x24   : > { %667 = vsyncadd (%p756_p1), [#allocation6], 4294966784  ;;  %v285_v0 = vld [vmem:[#allocation5 + $0x18] sm:$0xff]  ;;  %v284_v1 = vld [vmem:[#allocation5 + $0x10] sm:$0xff]  ;;  %vm290_vm0 = vcmask 261120   ;;  %s468_s26 = sshll.u32 %s686_s18, 3 }
  0x25   : > { %306 = vmatpush.msra.mxu0 %v285_v0  ;;  %v283_v2 = vld [vmem:[#allocation5 + $0x8] sm:$0xff]  ;;  %v282_v3 = vld [vmem:[#allocation5] sm:$0xff]  ;;  %v281_v4 = vld [vmem:[%s238_s23] sm:$0xff]  ;;  %s333_s25 = scalar_lea.hbm %s877_s4, %s468_s26  ;;  %s274_s28 = scalar_lea.vmem [#allocation7], %s463_s10  ;;  %vm319_vm1 = vcmask 523264  }
  0x26   : > { %v546_v5 = vld [vmem:[%s875_s2] ss:$0 sm:$0xff]  ;;  %s335_s29 = sshll.u32 %s274_s28, 4  ;;  %s337_s30 = sshll.u32 %s333_s25, 4  ;;  %s336_s29 = int_to_ptr.vmem [resolvable:$true] %s335_s29  ;;  %s338_s30 = int_to_ptr.hbm [resolvable:$true] %s337_s30 }
  0x27   : > { %307 = vmatpush.msra.mxu0 %v284_v1  ;;  %v547_v6 = vld [vmem:[%s876_s3] ss:$0 sm:$0xff]  ;;  %s322_s18 = scalar_lea.sflag [#allocation4], %s817_s7  ;;  %s622_s5 = sshra.s32 %s338_s30, 4  ;;  %s623_s5 = int_to_ptr.hbm [resolvable:$true] %s622_s5 }
  0x28   : > { %s624_s24 = scalar_lea.hbm %s623_s5, 8  ;;  %s628_s10 = scalar_lea.hbm %s877_s4, 16 }
  0x29   : > { %308 = vmatpush.msra.mxu0 %v283_v2  ;;  %p625_p1 = scmp.ne.s32.totalorder %s623_s5, %s624_s24  ;;  %p629_p10 = scmp.lt.s32.totalorder %s623_s5, %s877_s4 }
  0x2a   : > { %p630_p11 = scmp.lt.s32.totalorder %s628_s10, %s624_s24 }
  0x2b   : > { %309 = vmatpush.msra.mxu0 %v282_v3  ;;  %p626_p3 = pnand %p625_p1, %p795_p4 }
  0x2c   : > { %466 = vmatmul.msk.f32.vlgmr.msra.gmra.mxu0 %vm290_vm0, %v281_v4  ;;  %p631_p12 = por %p630_p11, %p629_p10 }
  0x2d   : > { %p627_p9 = pneg %p626_p3 }
  0x2f   : > { %p632_p13 = pnand %p631_p12, %p627_p9 }
  0xa9   : > { %v311_v7 = vpop.f32.mrf.mxu0 }
  0xaa   : > { %v312_v8 = vadd.f32 %v546_v5, %v311_v7 }
  0xac   : > { %v318_v9 = vmul.f32 %v547_v6, %v312_v8 }
  0xae   : > { %320 = vst.msk [vmem:[%s274_s28] sm:$0xff] %vm319_vm1, %v318_v9 }
  0xaf   : > { %635 = shalt.err (!%p632_p13)
}
  0xb0   : > { %477 = dma.vmem_to_hbm [thread:$0]  (%p795_p4), %s336_s29, 128, %s338_s30, %s322_s18  }
  0xb1 PF: > { %s349_s7 = sand.u32 1, %s674_s15   ;;  %p488_p0 = pnand %p459_p6, %p803_p7 }
  0xb2   : > { %s350_s22 = scalar_lea.sflag [#allocation4], %s349_s7 }
  0xb3   : > { %p489_p2 = pneg %p488_p0 }
  0xb5   : > { %669 = dma.done.wait (%p489_p2), %s350_s22, 128  }
  0xb6   : > { %671 = vsyncadd (%p489_p2), %s350_s22, 4294967168  ;;  %s21_s20 = sadd.s32 1, %s694_s20   ;;  %s884_s15 = smov %s678_s16 }
  0xb7   : > { %p18_p5 = scmp.ge.s32.totalorder %s21_s20, 4   ;;  %s885_s16 = smov %s682_s17 }
  0xb8   : > { %s886_s17 = smov %s801_s12  ;;  %s887_s18 = smov %s690_s19 }
  0xb9   : > { %s888_s19 = smov %s890_s6  ;;  %20 = sbr.rel (!%p18_p5) target bundleno = 7 (0x7), region = 92 }
  0xbe   :  { %356 = vsyncpa [#allocation3], 1 }
  0xbf   :  { %358 = vsyncpa [#allocation3 + $0x1], 1 }
  0xc0   :  { %359 = vsyncpa [#allocation6], 1 }
  0xc1   :  { %360 = vsyncpa [#allocation4], 1 }
  0xc2   :  { %362 = vsyncpa [#allocation4 + $0x1], 1 }

</bundles_post_ra>
